<compile_context>
chip_gen: v6e
topology: v6e:2x2x1
jax: 0.10.0
libtpu: 0.0.40
codegen_flags: <defaults>
</compile_context>

<pallas_src>
import functools

import jax
import jax.numpy as jnp
import numpy as np
from jax.experimental import pallas as pl
from jax.experimental.pallas import tpu as pltpu


def _round_up(n, m):
    return ((n + m - 1) // m) * m


def _make_layout(*, input_size, hidden_size, num_layers, seq_length, num_classes,
                 batch_block):
    """Static row/lane layout of the single packed parameter buffer."""
    H = hidden_size
    GP = _round_up(3 * H, 128)            # [i|g|o] gate columns, lane-dense pad
    XP = _round_up(input_size, 128)       # lane-dense padded x width
    SEQ = seq_length
    SEQP = _round_up(SEQ, 128)
    NC = int(num_classes[0]) + int(num_classes[1])
    NCP = _round_up(NC, 128)
    W = max(GP, SEQP, NCP)                # common lane width of the packed buffer

    TB = batch_block
    assert TB % 8 == 0, "batch block must be a multiple of 8 sublanes"
    b_gate_rows = _round_up(TB, 8)                 # gate bias replicated per batch row
    b_lin_rows = _round_up(num_layers * TB, 8)     # fc1/head bias replicated L*TB rows

    row = 0
    w_ih_off, b_gate_off, k_feats = [], [], []
    for l in range(num_layers):
        # Contraction rows are reserved at full lane-dense K (zero pad rows),
        # so garbage pad lanes of the previous activation contribute exactly 0.
        K = XP if l == 0 else GP
        k_feats.append(K)
        w_ih_off.append(row)
        row += K
        b_gate_off.append(row)
        row += b_gate_rows
    w_fc1_off = row; row += GP            # rows [H:GP] stay zero
    b_fc1_off = row; row += b_lin_rows
    w_head_off = row; row += SEQP         # rows [SEQ:SEQP] stay zero
    b_head_off = row; row += b_lin_rows

    return dict(
        H=H, GP=GP, XP=XP, SEQ=SEQ, SEQP=SEQP, NC=NC, NCP=NCP, W=W,
        TB=TB, b_gate_rows=b_gate_rows, b_lin_rows=b_lin_rows,
        num_layers=num_layers, k_feats=k_feats, input_size=input_size,
        w_ih=w_ih_off, b_gate=b_gate_off,
        w_fc1=w_fc1_off, b_fc1=b_fc1_off,
        w_head=w_head_off, b_head=b_head_off,
        total_rows=row, num_classes=(int(num_classes[0]), int(num_classes[1])),
    )


def pack_params(params, layout):
    """Pack all live weights/biases (f-gate & w_hh dropped) into one f32 buffer.

    Biases are pre-replicated across their batch rows; all contraction pad rows
    are left zero so padded/garbage lanes of activations contribute nothing.
    """
    H = layout["H"]
    L = layout["num_layers"]
    buf = jnp.zeros((layout["total_rows"], layout["W"]), jnp.float32)

    brows = layout["b_gate_rows"]
    for l in range(L):
        w_ih, _w_hh, b_ih, b_hh = params["lstm"][l]          # w_ih: (in_feat, 4H)
        # PyTorch gate order [i, f, g, o]; drop f (multiplies c_0 == 0).
        w_igo = jnp.concatenate(
            [w_ih[:, 0:H], w_ih[:, 2 * H:3 * H], w_ih[:, 3 * H:4 * H]], axis=1)
        b = b_ih + b_hh
        b_igo = jnp.concatenate([b[0:H], b[2 * H:3 * H], b[3 * H:4 * H]])
        wo = layout["w_ih"][l]
        buf = buf.at[wo:wo + w_igo.shape[0], 0:w_igo.shape[1]].set(w_igo)
        bo = layout["b_gate"][l]
        buf = buf.at[bo:bo + brows, 0:3 * H].set(
            jnp.broadcast_to(b_igo, (brows, 3 * H)))

    lrows = layout["b_lin_rows"]
    buf = buf.at[layout["w_fc1"]:layout["w_fc1"] + H,
                 0:layout["SEQ"]].set(params["w_fc1"])
    buf = buf.at[layout["b_fc1"]:layout["b_fc1"] + lrows, 0:layout["SEQ"]].set(
        jnp.broadcast_to(params["b_fc1"], (lrows, layout["SEQ"])))

    # Fused head: [fc_a | fc_b] in one matmul.
    w_head = jnp.concatenate([params["w_a"], params["w_b"]], axis=1)   # (SEQ, nc0+nc1)
    b_head = jnp.concatenate([params["b_a"], params["b_b"]])
    buf = buf.at[layout["w_head"]:layout["w_head"] + layout["SEQ"],
                 0:w_head.shape[1]].set(w_head)
    buf = buf.at[layout["b_head"]:layout["b_head"] + lrows, 0:b_head.shape[0]].set(
        jnp.broadcast_to(b_head, (lrows, b_head.shape[0])))
    return buf


def _lstm_head_kernel(layout, x_ref, buf_ref, out_ref):
    """One batch block of the whole forward pass; all operands VMEM-resident."""
    H = layout["H"]
    GP = layout["GP"]
    SEQP = layout["SEQP"]
    NCP = layout["NCP"]
    L = layout["num_layers"]
    TB = layout["TB"]

    inp = x_ref[...]                                 # (TB, XP) f32, pad lanes are 0
    hs = []
    for l in range(L):
        K = layout["k_feats"][l]
        wo = layout["w_ih"][l]
        bo = layout["b_gate"][l]
        w = buf_ref[wo:wo + K, 0:GP]                 # (K, GP), cols [i|g|o|0], pad rows 0
        b = buf_ref[bo:bo + TB, 0:GP]                # (TB, GP) pre-replicated bias

        gates = jnp.dot(inp, w, preferred_element_type=jnp.float32) + b   # (TB, GP)
        # Whole-vreg activations (2 EUP passes), XLU rolls instead of
        # lane-offset slices.  Valid because seq_len == 1 and c_0 == 0.
        sig = jax.nn.sigmoid(gates)                  # lanes [0:H]=i, [2H:3H]=o
        tnh = jnp.tanh(gates)                        # lanes [H:2H]=g
        g_al = pltpu.roll(tnh, GP - H, axis=1)       # tanh(g) -> lanes [0:H]
        c_vec = sig * g_al                           # lanes [0:H] = i*tanh(g) = c
        o_al = pltpu.roll(sig, GP - 2 * H, axis=1)   # sigmoid(o) -> lanes [0:H]
        h_vec = o_al * jnp.tanh(c_vec)               # lanes [0:H]=h, rest bounded junk
        hs.append(h_vec)                             # keep full GP lanes (no slice)
        inp = h_vec                                  # next layer's pad rows are zero

    # hn: (num_layers, TB, H).view(-1, H) -> layers stacked along the batch axis.
    hn = jnp.concatenate(hs, axis=0)                 # (L*TB, GP) lane-dense
    hn = jnp.maximum(hn, 0.0)                        # relu(hn); junk lanes hit 0-rows

    M = L * TB
    w1 = buf_ref[layout["w_fc1"]:layout["w_fc1"] + GP, 0:SEQP]
    b1 = buf_ref[layout["b_fc1"]:layout["b_fc1"] + M, 0:SEQP]
    out = jnp.dot(hn, w1, preferred_element_type=jnp.float32) + b1        # fc_1
    out = jnp.maximum(out, 0.0)                      # relu(out); pad lanes stay 0

    wh = buf_ref[layout["w_head"]:layout["w_head"] + SEQP, 0:NCP]
    bh = buf_ref[layout["b_head"]:layout["b_head"] + M, 0:NCP]
    head = jnp.dot(out, wh, preferred_element_type=jnp.float32) + bh      # (M, NCP)

    # Lane-dense unmasked stores, layer-major to match hn.view(-1, H).
    for l in range(L):
        out_ref[l, :, :] = head[l * TB:(l + 1) * TB, :]


def lstm_network_forward(x, packed, layout):
    """Pads x, runs the batch-gridded pallas_call, slices the fused output."""
    B = x.shape[0]
    L = layout["num_layers"]
    TB = layout["TB"]
    XP = layout["XP"]
    NCP = layout["NCP"]
    nc0, nc1 = layout["num_classes"]

    padded_B = _round_up(B, TB)
    num_blocks = padded_B // TB
    x_p = jnp.zeros((padded_B, XP), jnp.float32)
    x_p = x_p.at[:B, :x.shape[1]].set(x.astype(jnp.float32))

    flops = 0
    for l in range(L):
        flops += 2 * TB * layout["k_feats"][l] * layout["GP"]
    flops += 2 * (L * TB) * layout["GP"] * layout["SEQP"]
    flops += 2 * (L * TB) * layout["SEQP"] * NCP
    flops *= num_blocks
    transcendentals = num_blocks * L * TB * 3 * layout["GP"]
    bytes_accessed = 4 * (int(x_p.size) + int(packed.size) + L * padded_B * NCP)

    kernel = functools.partial(_lstm_head_kernel, layout)
    out = pl.pallas_call(
        kernel,
        out_shape=jax.ShapeDtypeStruct((L, padded_B, NCP), jnp.float32),
        grid=(num_blocks,),
        in_specs=[
            pl.BlockSpec((TB, XP), lambda i: (i, 0)),
            pl.BlockSpec((layout["total_rows"], layout["W"]), lambda i: (0, 0)),
        ],
        out_specs=pl.BlockSpec((L, TB, NCP), lambda i: (0, i, 0)),
        compiler_params=pltpu.CompilerParams(
            dimension_semantics=("parallel",)),      # v7x: split batch over 2 TCs
        cost_estimate=pl.CostEstimate(
            flops=flops, transcendentals=transcendentals,
            bytes_accessed=bytes_accessed),
    )(x_p, packed)

    out = out[:, :B, :].reshape(L * B, NCP)          # drop batch pad, layer-major
    return out[:, :nc0], out[:, nc0:nc0 + nc1]


def init_params(key, *, input_size, hidden_size, num_layers, seq_length, num_classes):
    """Deterministic synthetic parameters (PyTorch-like uniform init)."""
    H = hidden_size
    bound = 1.0 / np.sqrt(H)

    def u(key, shape):
        return jax.random.uniform(key, shape, jnp.float32, -bound, bound)

    keys = iter(jax.random.split(key, 4 * num_layers + 6))
    lstm = []
    for l in range(num_layers):
        in_feat = input_size if l == 0 else H
        w_ih = u(next(keys), (in_feat, 4 * H))   # transposed vs torch (4H, in_feat)
        w_hh = u(next(keys), (H, 4 * H))
        b_ih = u(next(keys), (4 * H,))
        b_hh = u(next(keys), (4 * H,))
        lstm.append((w_ih, w_hh, b_ih, b_hh))

    params = {
        "lstm": lstm,
        "w_fc1": u(next(keys), (H, seq_length)),
        "b_fc1": u(next(keys), (seq_length,)),
        "w_a": u(next(keys), (seq_length, num_classes[0])),
        "b_a": u(next(keys), (num_classes[0],)),
        "w_b": u(next(keys), (seq_length, num_classes[1])),
        "b_b": u(next(keys), (num_classes[1],)),
    }
    return params


def reference_forward(x, params, *, num_layers, hidden_size, num_classes):
    """Pure-JAX reference mirroring the PyTorch forward (for verification)."""
    H = hidden_size
    inp = x.astype(jnp.float32)
    hs = []
    for l in range(num_layers):
        w_ih, w_hh, b_ih, b_hh = params["lstm"][l]
        gates = inp @ w_ih + b_ih + b_hh            # h_0 == 0
        i_g = jax.nn.sigmoid(gates[:, 0 * H:1 * H])
        g_g = jnp.tanh(gates[:, 2 * H:3 * H])
        o_g = jax.nn.sigmoid(gates[:, 3 * H:4 * H])
        h = o_g * jnp.tanh(i_g * g_g)               # c_0 == 0
        hs.append(h)
        inp = h
    hn = jnp.concatenate(hs, axis=0)
    out = jnp.maximum(hn, 0.0) @ params["w_fc1"] + params["b_fc1"]
    out_r = jnp.maximum(out, 0.0)
    out_a = out_r @ params["w_a"] + params["b_a"]
    out_b = out_r @ params["w_b"] + params["b_b"]
    return out_a, out_b


if __name__ == "__main__":
    # Small shapes consistent with the module's forward.
    B = 8
    INPUT_SIZE = 16
    HIDDEN = 32
    NUM_LAYERS = 2
    SEQ_LENGTH = 128
    NUM_CLASSES = (4, 6)

    key = jax.random.PRNGKey(0)
    k_x, k_p = jax.random.split(key)
    x = jax.random.normal(k_x, (B, INPUT_SIZE), jnp.float32)
    params = init_params(
        k_p, input_size=INPUT_SIZE, hidden_size=HIDDEN, num_layers=NUM_LAYERS,
        seq_length=SEQ_LENGTH, num_classes=NUM_CLASSES)

    # Batch block: up to one MXU pass worth of rows, multiple of 8 sublanes.
    TB = min(_round_up(B, 8), 128)
    layout = _make_layout(
        input_size=INPUT_SIZE, hidden_size=HIDDEN, num_layers=NUM_LAYERS,
        seq_length=SEQ_LENGTH, num_classes=NUM_CLASSES, batch_block=TB)
    packed = pack_params(params, layout)             # one-time wrapper-side packing

    out_a, out_b = lstm_network_forward(x, packed, layout)
    jax.block_until_ready((out_a, out_b))

    ref_a, ref_b = reference_forward(
        x, params, num_layers=NUM_LAYERS, hidden_size=HIDDEN, num_classes=NUM_CLASSES)
    np.testing.assert_allclose(np.asarray(out_a), np.asarray(ref_a), rtol=1e-5, atol=1e-5)
    np.testing.assert_allclose(np.asarray(out_b), np.asarray(ref_b), rtol=1e-5, atol=1e-5)

    assert out_a.shape == (NUM_LAYERS * B, NUM_CLASSES[0])
    assert out_b.shape == (NUM_LAYERS * B, NUM_CLASSES[1])
    print("KERNEL_OK")
</pallas_src>

<mosaic_0001>
module attributes {stable_mosaic.version = 11 : i64} {
  func.func @_lstm_head_kernel(%arg0: i32, %arg1: memref<8x128xf32, #tpu.memory_space<vmem>>, %arg2: memref<560x128xf32, #tpu.memory_space<vmem>>, %arg3: memref<2x8x128xf32, #tpu.memory_space<vmem>>) attributes {dimension_semantics = [#tpu.dimension_semantics<parallel>], iteration_bounds = array<i64: 1>, scalar_prefetch = 0 : i64, scratch_operands = 0 : i64, tpu.core_type = #tpu.core_type<tc>, window_params = [{transform_indices = @transform_0, window_bounds = array<i64: 8, 128>}, {pipeline_mode = #tpu.pipeline_mode<synchronous>, transform_indices = @transform_1, window_bounds = array<i64: 560, 128>}, {transform_indices = @transform_2, window_bounds = array<i64: 2, 8, 128>}]} {
    %c0 = arith.constant 0 : index
    %c0_0 = arith.constant 0 : index
    %0 = vector.load %arg1[%c0, %c0_0] : memref<8x128xf32, #tpu.memory_space<vmem>>, vector<8x128xf32>
    %c0_1 = arith.constant 0 : index
    %c0_2 = arith.constant 0 : index
    %1 = vector.load %arg2[%c0_1, %c0_2] : memref<560x128xf32, #tpu.memory_space<vmem>>, vector<128x128xf32>
    %c128 = arith.constant 128 : index
    %c0_3 = arith.constant 0 : index
    %2 = vector.load %arg2[%c128, %c0_3] : memref<560x128xf32, #tpu.memory_space<vmem>>, vector<8x128xf32>
    %cst = arith.constant dense<0.000000e+00> : vector<8x128xf32>
    %3 = tpu.matmul %0, %1, %cst {dimension_numbers = #tpu.dot_dimension_numbers<[1], [0], [0], [1], [0, 0, 1, 1], [], []>} : vector<8x128xf32>, vector<128x128xf32>, vector<8x128xf32> -> vector<8x128xf32>
    %4 = arith.addf %3, %2 : vector<8x128xf32>
    %5 = arith.negf %4 : vector<8x128xf32>
    %6 = math.exp %5 : vector<8x128xf32>
    %cst_4 = arith.constant 1.000000e+00 : f32
    %7 = vector.broadcast %cst_4 : f32 to vector<8x128xf32>
    %8 = arith.addf %7, %6 : vector<8x128xf32>
    %9 = arith.divf %7, %8 : vector<8x128xf32>
    %10 = math.tanh %4 : vector<8x128xf32>
    %c96_i32 = arith.constant 96 : i32
    %11 = tpu.dynamic_rotate %10 by %c96_i32 dim 1 : vector<8x128xf32>, i32 -> vector<8x128xf32>
    %12 = arith.mulf %9, %11 : vector<8x128xf32>
    %c64_i32 = arith.constant 64 : i32
    %13 = tpu.dynamic_rotate %9 by %c64_i32 dim 1 : vector<8x128xf32>, i32 -> vector<8x128xf32>
    %14 = math.tanh %12 : vector<8x128xf32>
    %15 = arith.mulf %13, %14 : vector<8x128xf32>
    %c136 = arith.constant 136 : index
    %c0_5 = arith.constant 0 : index
    %16 = vector.load %arg2[%c136, %c0_5] : memref<560x128xf32, #tpu.memory_space<vmem>>, vector<128x128xf32>
    %c264 = arith.constant 264 : index
    %c0_6 = arith.constant 0 : index
    %17 = vector.load %arg2[%c264, %c0_6] : memref<560x128xf32, #tpu.memory_space<vmem>>, vector<8x128xf32>
    %cst_7 = arith.constant dense<0.000000e+00> : vector<8x128xf32>
    %18 = tpu.matmul %15, %16, %cst_7 {dimension_numbers = #tpu.dot_dimension_numbers<[1], [0], [0], [1], [0, 0, 1, 1], [], []>} : vector<8x128xf32>, vector<128x128xf32>, vector<8x128xf32> -> vector<8x128xf32>
    %19 = arith.addf %18, %17 : vector<8x128xf32>
    %20 = arith.negf %19 : vector<8x128xf32>
    %21 = math.exp %20 : vector<8x128xf32>
    %cst_8 = arith.constant 1.000000e+00 : f32
    %22 = vector.broadcast %cst_8 : f32 to vector<8x128xf32>
    %23 = arith.addf %22, %21 : vector<8x128xf32>
    %24 = arith.divf %22, %23 : vector<8x128xf32>
    %25 = math.tanh %19 : vector<8x128xf32>
    %c96_i32_9 = arith.constant 96 : i32
    %26 = tpu.dynamic_rotate %25 by %c96_i32_9 dim 1 : vector<8x128xf32>, i32 -> vector<8x128xf32>
    %27 = arith.mulf %24, %26 : vector<8x128xf32>
    %c64_i32_10 = arith.constant 64 : i32
    %28 = tpu.dynamic_rotate %24 by %c64_i32_10 dim 1 : vector<8x128xf32>, i32 -> vector<8x128xf32>
    %29 = math.tanh %27 : vector<8x128xf32>
    %30 = arith.mulf %28, %29 : vector<8x128xf32>
    %31 = tpu.concatenate %15, %30 in 0 : vector<8x128xf32>, vector<8x128xf32> -> vector<16x128xf32>
    %cst_11 = arith.constant 0.000000e+00 : f32
    %32 = vector.broadcast %cst_11 : f32 to vector<16x128xf32>
    %33 = arith.maximumf %31, %32 : vector<16x128xf32>
    %c272 = arith.constant 272 : index
    %c0_12 = arith.constant 0 : index
    %34 = vector.load %arg2[%c272, %c0_12] : memref<560x128xf32, #tpu.memory_space<vmem>>, vector<128x128xf32>
    %c400 = arith.constant 400 : index
    %c0_13 = arith.constant 0 : index
    %35 = vector.load %arg2[%c400, %c0_13] : memref<560x128xf32, #tpu.memory_space<vmem>>, vector<16x128xf32>
    %cst_14 = arith.constant dense<0.000000e+00> : vector<16x128xf32>
    %36 = tpu.matmul %33, %34, %cst_14 {dimension_numbers = #tpu.dot_dimension_numbers<[1], [0], [0], [1], [0, 0, 1, 1], [], []>} : vector<16x128xf32>, vector<128x128xf32>, vector<16x128xf32> -> vector<16x128xf32>
    %37 = arith.addf %36, %35 : vector<16x128xf32>
    %cst_15 = arith.constant 0.000000e+00 : f32
    %38 = vector.broadcast %cst_15 : f32 to vector<16x128xf32>
    %39 = arith.maximumf %37, %38 : vector<16x128xf32>
    %c416 = arith.constant 416 : index
    %c0_16 = arith.constant 0 : index
    %40 = vector.load %arg2[%c416, %c0_16] : memref<560x128xf32, #tpu.memory_space<vmem>>, vector<128x128xf32>
    %c544 = arith.constant 544 : index
    %c0_17 = arith.constant 0 : index
    %41 = vector.load %arg2[%c544, %c0_17] : memref<560x128xf32, #tpu.memory_space<vmem>>, vector<16x128xf32>
    %cst_18 = arith.constant dense<0.000000e+00> : vector<16x128xf32>
    %42 = tpu.matmul %39, %40, %cst_18 {dimension_numbers = #tpu.dot_dimension_numbers<[1], [0], [0], [1], [0, 0, 1, 1], [], []>} : vector<16x128xf32>, vector<128x128xf32>, vector<16x128xf32> -> vector<16x128xf32>
    %43 = arith.addf %42, %41 : vector<16x128xf32>
    %44 = vector.extract_strided_slice %43 {offsets = [0, 0], sizes = [8, 128], strides = [1, 1]} : vector<16x128xf32> to vector<8x128xf32>
    %c0_19 = arith.constant 0 : index
    %c0_20 = arith.constant 0 : index
    %c0_21 = arith.constant 0 : index
    %45 = vector.load %arg3[%c0_19, %c0_20, %c0_21] : memref<2x8x128xf32, #tpu.memory_space<vmem>>, vector<1x8x128xf32>
    %46 = vector.shape_cast %45 : vector<1x8x128xf32> to vector<8x128xf32>
    %47 = vector.shape_cast %44 : vector<8x128xf32> to vector<1x8x128xf32>
    tpu.vector_store %arg3[%c0_19, %c0_20, %c0_21], %47 {strides = array<i32>} : memref<2x8x128xf32, #tpu.memory_space<vmem>>, vector<1x8x128xf32>,
    %48 = vector.extract_strided_slice %43 {offsets = [8, 0], sizes = [8, 128], strides = [1, 1]} : vector<16x128xf32> to vector<8x128xf32>
    %c1 = arith.constant 1 : index
    %c0_22 = arith.constant 0 : index
    %c0_23 = arith.constant 0 : index
    %49 = vector.load %arg3[%c1, %c0_22, %c0_23] : memref<2x8x128xf32, #tpu.memory_space<vmem>>, vector<1x8x128xf32>
    %50 = vector.shape_cast %49 : vector<1x8x128xf32> to vector<8x128xf32>
    %51 = vector.shape_cast %48 : vector<8x128xf32> to vector<1x8x128xf32>
    tpu.vector_store %arg3[%c1, %c0_22, %c0_23], %51 {strides = array<i32>} : memref<2x8x128xf32, #tpu.memory_space<vmem>>, vector<1x8x128xf32>,
    return
  }
  func.func @transform_0(%arg0: i32) -> (i32, i32) {
    %c0_i32 = arith.constant 0 : i32
    %c0_i32_0 = arith.constant 0 : i32
    return %arg0, %c0_i32 : i32, i32
  }
  func.func @transform_1(%arg0: i32) -> (i32, i32) {
    %c0_i32 = arith.constant 0 : i32
    %c0_i32_0 = arith.constant 0 : i32
    %c0_i32_1 = arith.constant 0 : i32
    return %c0_i32, %c0_i32_0 : i32, i32
  }
  func.func @transform_2(%arg0: i32) -> (i32, i32, i32) {
    %c0_i32 = arith.constant 0 : i32
    %c0_i32_0 = arith.constant 0 : i32
    %c0_i32_1 = arith.constant 0 : i32
    return %c0_i32, %arg0, %c0_i32_0 : i32, i32, i32
  }
}

</mosaic_0001>

<bundles_post_ra>
// kernel: tpu_custom_call.1
= control target key start
LH: loop header
LB: loop body
LE: loop exit
PB: predicated region body
PF: predicated region fallthrough
CT: control target
= control target key end

     0   :  { %7 = vsyncpa [#allocation3], 0  ;;  %s832_s0 = inlined_call_operand.hbm [shape: f32[8,128], index: 0, kind: input, shape index: {}]   ;;  %s833_s1 = inlined_call_operand.hbm [shape: f32[560,128], index: 1, kind: input, shape index: {}]   ;;  %s834_s2 = inlined_call_operand.hbm [shape: f32[2,8,128], index: 2, kind: output, shape index: {}]  }
   0x1   :  { %8 = vsyncpa [#allocation6], 0 }
   0x2   :  { %9 = vsyncpa [#allocation4], 0  ;;  %s755_s9 = smov [#allocation2]   ;;  %s756_s11 = smov [#allocation5]  }
   0x3   :  { %s16_s10 = sshll.u32 %s755_s9, 4  ;;  %s25_s12 = sshll.u32 %s756_s11, 4  ;;  %s17_s10 = int_to_ptr.vmem [resolvable:$true] %s16_s10  ;;  %s26_s12 = int_to_ptr.vmem [resolvable:$true] %s25_s12 }
   0x4   :  { %s697_s13 = scalar_lea.vmem %s17_s10, 128  ;;  %p702_p1 = scmp.lt.s32.totalorder %s17_s10, %s17_s10 }
   0x5   :  { %p698_p0 = scmp.ne.s32.totalorder %s17_s10, %s697_s13  ;;  %p703_p2 = scmp.lt.s32.totalorder %s697_s13, %s697_s13 }
   0x7   :  { %p704_p3 = por %p703_p2, %p702_p1 }
   0x9   :  { %p705_p4 = pnand %p704_p3, %p698_p0 }
   0xb   :  { %708 = shalt.err (!%p705_p4)
}
   0xc   :  { %19 = dma.hbm_to_vmem [thread:$0]  %s832_s0, 128, %s17_s10, [#allocation3]  }
   0xd   :  { %s717_s16 = scalar_lea.vmem %s26_s12, 8960  ;;  %p722_p6 = scmp.lt.s32.totalorder %s26_s12, %s26_s12 }
   0xe   :  { %p718_p5 = scmp.ne.s32.totalorder %s26_s12, %s717_s16  ;;  %p723_p7 = scmp.lt.s32.totalorder %s717_s16, %s717_s16 }
  0x10   :  { %p724_p8 = por %p723_p7, %p722_p6 }
  0x12   :  { %p725_p9 = pnand %p724_p8, %p718_p5 }
  0x14   :  { %728 = shalt.err (!%p725_p9)
}
  0x15   :  { %s757_s17 = smov 128   ;;  %s758_s18 = smov 8  }
  0x16   :  { %31 = dma.hbm_to_vmem [thread:$0]  %s833_s1, 8960, %s26_s12, [#allocation6], %s757_s17, %s757_s17, %s758_s18  }
  0x17   :  { %749 = dma.done.wait [#allocation3], 128  }
  0x18   :  { %750 = vsyncadd [#allocation3], 4294967168 }
  0x19   :  { %751 = dma.done.wait [#allocation6], 8960  }
  0x1a   :  { %752 = vsyncadd [#allocation6], 4294958336  ;;  %v759_v0 = vmov 0.0   ;;  %vm760_vm0 = vmmov 0   ;;  %v54_v1 = vld [vmem:[#allocation5 + $0x78] sm:$0xff]  ;;  %v53_v2 = vld [vmem:[#allocation5 + $0x70] sm:$0xff] }
  0x1b   :  { %524 = vmatprep.subr.mxu0 %v759_v0  ;;  %556 = vmatprep.mubr.msk.f32.mxu0 %vm760_vm0, %v759_v0  ;;  %v52_v3 = vld [vmem:[#allocation5 + $0x68] sm:$0xff]  ;;  %v51_v4 = vld [vmem:[#allocation5 + $0x60] sm:$0xff]  ;;  %v50_v5 = vld [vmem:[#allocation5 + $0x58] sm:$0xff]  ;;  %s761_s0 = smov 96   ;;  %s762_s1 = smov 64  }
  0x1c   :  { %559 = vmatprep.subr.mxu1 %v759_v0  ;;  %591 = vmatprep.mubr.msk.f32.mxu1 %vm760_vm0, %v759_v0  ;;  %v49_v6 = vld [vmem:[#allocation5 + $0x50] sm:$0xff]  ;;  %v48_v7 = vld [vmem:[#allocation5 + $0x48] sm:$0xff]  ;;  %v47_v8 = vld [vmem:[#allocation5 + $0x40] sm:$0xff]  ;;  %s763_s21 = smov [#allocation7]  }
  0x1d   :  { %525 = vmatpush3.msra.mxu0 %v54_v1  ;;  %v46_v9 = vld [vmem:[#allocation5 + $0x38] sm:$0xff]  ;;  %v45_v10 = vld [vmem:[#allocation5 + $0x30] sm:$0xff]  ;;  %v44_v11 = vld [vmem:[#allocation5 + $0x28] sm:$0xff]  ;;  %s439_s22 = sshll.u32 %s763_s21, 4  ;;  %s440_s22 = int_to_ptr.vmem [resolvable:$true] %s439_s22 }
  0x1e   :  { %526 = vmatprep.subr.mxu0 %v759_v0  ;;  %v43_v12 = vld [vmem:[#allocation5 + $0x20] sm:$0xff]  ;;  %v42_v13 = vld [vmem:[#allocation5 + $0x18] sm:$0xff]  ;;  %v41_v14 = vld [vmem:[#allocation5 + $0x10] sm:$0xff]  ;;  %s729_s23 = scalar_lea.vmem %s440_s22, 256  ;;  %p734_p11 = scmp.lt.s32.totalorder %s440_s22, %s440_s22 }
  0x1f   :  { %527 = vmatpush3.msra.mxu0 %v53_v2  ;;  %v40_v15 = vld [vmem:[#allocation5 + $0x8] sm:$0xff]  ;;  %v39_v16 = vld [vmem:[#allocation5] sm:$0xff]  ;;  %v38_v17 = vld [vmem:[#allocation2] sm:$0xff]  ;;  %p730_p10 = scmp.ne.s32.totalorder %s440_s22, %s729_s23  ;;  %p735_p12 = scmp.lt.s32.totalorder %s729_s23, %s729_s23 }
  0x20   :  { %528 = vmatprep.subr.mxu0 %v759_v0  ;;  %v155_v18 = vld [vmem:[#allocation5 + $0x100] sm:$0xff]  ;;  %v154_v19 = vld [vmem:[#allocation5 + $0xf8] sm:$0xff]  ;;  %v153_v20 = vld [vmem:[#allocation5 + $0xf0] sm:$0xff] }
  0x21   :  { %529 = vmatpush3.msra.mxu0 %v52_v3  ;;  %560 = vmatpush3.msra.mxu1 %v155_v18  ;;  %v152_v21 = vld [vmem:[#allocation5 + $0xe8] sm:$0xff]  ;;  %v151_v22 = vld [vmem:[#allocation5 + $0xe0] sm:$0xff]  ;;  %v150_v23 = vld [vmem:[#allocation5 + $0xd8] sm:$0xff]  ;;  %p736_p13 = por %p735_p12, %p734_p11 }
  0x22   :  { %530 = vmatprep.subr.mxu0 %v759_v0  ;;  %561 = vmatprep.subr.mxu1 %v759_v0  ;;  %v55_v24 = vld [vmem:[#allocation5 + $0x80] sm:$0xff]  ;;  %v149_v29 = vld [vmem:[#allocation5 + $0xd0] sm:$0xff]  ;;  %v148_v30 = vld [vmem:[#allocation5 + $0xc8] sm:$0xff] }
  0x23   :  { %531 = vmatpush3.msra.mxu0 %v51_v4  ;;  %562 = vmatpush3.msra.mxu1 %v154_v19  ;;  %v147_v31 = vld [vmem:[#allocation5 + $0xc0] sm:$0xff]  ;;  %v146_v32 = vld [vmem:[#allocation5 + $0xb8] sm:$0xff]  ;;  %v145_v33 = vld [vmem:[#allocation5 + $0xb0] sm:$0xff]  ;;  %p737_p0 = pnand %p736_p13, %p730_p10 }
  0x24   :  { %532 = vmatprep.subr.mxu0 %v759_v0  ;;  %563 = vmatprep.subr.mxu1 %v759_v0  ;;  %v144_v34 = vld [vmem:[#allocation5 + $0xa8] sm:$0xff]  ;;  %v143_v35 = vld [vmem:[#allocation5 + $0xa0] sm:$0xff]  ;;  %v142_v37 = vld [vmem:[#allocation5 + $0x98] sm:$0xff] }
  0x25   :  { %533 = vmatpush3.msra.mxu0 %v50_v5  ;;  %564 = vmatpush3.msra.mxu1 %v153_v20  ;;  %v141_v39 = vld [vmem:[#allocation5 + $0x90] sm:$0xff]  ;;  %v140_v41 = vld [vmem:[#allocation5 + $0x88] sm:$0xff]  ;;  %v257_v50 = vld [vmem:[#allocation5 + $0x180] sm:$0xff] }
  0x26   :  { %534 = vmatprep.subr.mxu0 %v759_v0  ;;  %565 = vmatprep.subr.mxu1 %v759_v0  ;;  %v258_v49 = vld [vmem:[#allocation5 + $0x188] sm:$0xff]  ;;  %v256_v51 = vld [vmem:[#allocation5 + $0x178] sm:$0xff]  ;;  %v255_v52 = vld [vmem:[#allocation5 + $0x170] sm:$0xff] }
  0x27   :  { %535 = vmatpush3.msra.mxu0 %v49_v6  ;;  %566 = vmatpush3.msra.mxu1 %v152_v21  ;;  %v254_v53 = vld [vmem:[#allocation5 + $0x168] sm:$0xff]  ;;  %v253_v59 = vld [vmem:[#allocation5 + $0x160] sm:$0xff]  ;;  %v252_v60 = vld [vmem:[#allocation5 + $0x158] sm:$0xff] }
  0x28   :  { %536 = vmatprep.subr.mxu0 %v759_v0  ;;  %567 = vmatprep.subr.mxu1 %v759_v0  ;;  %v156_v54 = vld [vmem:[#allocation5 + $0x108] sm:$0xff]  ;;  %v251_v61 = vld [vmem:[#allocation5 + $0x150] sm:$0xff]  ;;  %v249_v63 = vld [vmem:[#allocation5 + $0x140] sm:$0xff] }
  0x29   :  { %537 = vmatpush3.msra.mxu0 %v48_v7  ;;  %568 = vmatpush3.msra.mxu1 %v151_v22  ;;  %v250_v62 = vld [vmem:[#allocation5 + $0x148] sm:$0xff]  ;;  %v247_v1 = vld [vmem:[#allocation5 + $0x130] sm:$0xff]  ;;  %v245_v4 = vld [vmem:[#allocation5 + $0x120] sm:$0xff] }
  0x2a   :  { %538 = vmatprep.subr.mxu0 %v759_v0  ;;  %569 = vmatprep.subr.mxu1 %v759_v0  ;;  %v246_v2 = vld [vmem:[#allocation5 + $0x128] sm:$0xff]  ;;  %v244_v7 = vld [vmem:[#allocation5 + $0x118] sm:$0xff]  ;;  %v344_v19 = vld [vmem:[#allocation5 + $0x1d0] sm:$0xff] }
  0x2b   :  { %539 = vmatpush3.msra.mxu0 %v47_v8  ;;  %570 = vmatpush3.msra.mxu1 %v150_v23  ;;  %v243_v8 = vld [vmem:[#allocation5 + $0x110] sm:$0xff]  ;;  %v345_v18 = vld [vmem:[#allocation5 + $0x1d8] sm:$0xff]  ;;  %v343_v20 = vld [vmem:[#allocation5 + $0x1c8] sm:$0xff] }
  0x2c   :  { %540 = vmatprep.subr.mxu0 %v759_v0  ;;  %571 = vmatprep.subr.mxu1 %v759_v0  ;;  %v342_v21 = vld [vmem:[#allocation5 + $0x1c0] sm:$0xff] }
  0x2d   :  { %541 = vmatpush3.msra.mxu0 %v46_v9  ;;  %572 = vmatpush3.msra.mxu1 %v149_v29  ;;  %v353_v9 = vld [vmem:[#allocation5 + $0x218] sm:$0xff]  ;;  %v340_v29 = vld [vmem:[#allocation5 + $0x1b0] sm:$0xff] }
  0x2e   :  { %542 = vmatprep.subr.mxu0 %v759_v0  ;;  %573 = vmatprep.subr.mxu1 %v759_v0 }
  0x2f   :  { %543 = vmatpush3.msra.mxu0 %v45_v10  ;;  %574 = vmatpush3.msra.mxu1 %v148_v30  ;;  %v352_v10 = vld [vmem:[#allocation5 + $0x210] sm:$0xff]  ;;  %v339_v30 = vld [vmem:[#allocation5 + $0x1a8] sm:$0xff] }
  0x30   :  { %544 = vmatprep.subr.mxu0 %v759_v0  ;;  %575 = vmatprep.subr.mxu1 %v759_v0 }
  0x31   :  { %545 = vmatpush3.msra.mxu0 %v44_v11  ;;  %576 = vmatpush3.msra.mxu1 %v147_v31  ;;  %v351_v11 = vld [vmem:[#allocation5 + $0x208] sm:$0xff]  ;;  %v338_v31 = vld [vmem:[#allocation5 + $0x1a0] sm:$0xff] }
  0x32   :  { %546 = vmatprep.subr.mxu0 %v759_v0  ;;  %577 = vmatprep.subr.mxu1 %v759_v0 }
  0x33   :  { %547 = vmatpush3.msra.mxu0 %v43_v12  ;;  %578 = vmatpush3.msra.mxu1 %v146_v32  ;;  %v350_v12 = vld [vmem:[#allocation5 + $0x200] sm:$0xff]  ;;  %v260_v32 = vld [vmem:[#allocation5 + $0x198] sm:$0xff] }
  0x34   :  { %548 = vmatprep.subr.mxu0 %v759_v0  ;;  %579 = vmatprep.subr.mxu1 %v759_v0 }
  0x35   :  { %549 = vmatpush3.msra.mxu0 %v42_v13  ;;  %580 = vmatpush3.msra.mxu1 %v145_v33  ;;  %v349_v13 = vld [vmem:[#allocation5 + $0x1f8] sm:$0xff] }
  0x36   :  { %550 = vmatprep.subr.mxu0 %v759_v0  ;;  %581 = vmatprep.subr.mxu1 %v759_v0 }
  0x37   :  { %551 = vmatpush3.msra.mxu0 %v41_v14  ;;  %582 = vmatpush3.msra.mxu1 %v144_v34  ;;  %v259_v34 = vld [vmem:[#allocation5 + $0x190] sm:$0xff] }
  0x38   :  { %552 = vmatprep.subr.mxu0 %v759_v0  ;;  %583 = vmatprep.subr.mxu1 %v759_v0 }
  0x39   :  { %553 = vmatpush3.msra.mxu0 %v40_v15  ;;  %584 = vmatpush3.msra.mxu1 %v143_v35  ;;  %v348_v15 = vld [vmem:[#allocation5 + $0x1f0] sm:$0xff] }
  0x3a   :  { %554 = vmatprep.subr.mxu0 %v759_v0  ;;  %585 = vmatprep.subr.mxu1 %v759_v0 }
  0x3b   :  { %555 = vmatpush3.msra.mxu0 %v39_v16  ;;  %586 = vmatpush3.msra.mxu1 %v142_v37  ;;  %v347_v16 = vld [vmem:[#allocation5 + $0x1e8] sm:$0xff] }
  0x3c   :  { %557 = vmatmul.mubr.f32.vlgmr.msra.gmra.mxu0 %v38_v17  ;;  %587 = vmatprep.subr.mxu1 %v759_v0  ;;  %v346_v17 = vld [vmem:[#allocation5 + $0x1e0] sm:$0xff] }
  0x3d   :  { %588 = vmatpush3.msra.mxu1 %v141_v39  ;;  %594 = vmatprep.subr.mxu0 %v258_v49 }
  0x3e   :  { %589 = vmatprep.subr.mxu1 %v759_v0  ;;  %595 = vmatpush3.msra.mxu0 %v258_v49  ;;  %v248_v0 = vld [vmem:[#allocation5 + $0x138] sm:$0xff] }
  0x3f   :  { %590 = vmatpush3.msra.mxu1 %v140_v41  ;;  %596 = vmatprep.subr.mxu0 %v257_v50 }
  0x40   :  { %597 = vmatpush3.msra.mxu0 %v257_v50  ;;  %629 = vmatprep.subr.mxu1 %v353_v9 }
  0x41   :  { %598 = vmatprep.subr.mxu0 %v256_v51 }
  0x42   :  { %599 = vmatpush3.msra.mxu0 %v256_v51 }
  0x43   :  { %600 = vmatprep.subr.mxu0 %v255_v52 }
  0x44   :  { %601 = vmatpush3.msra.mxu0 %v255_v52 }
  0x45   :  { %602 = vmatprep.subr.mxu0 %v254_v53 }
  0x46   :  { %603 = vmatpush3.msra.mxu0 %v254_v53 }
  0x47   :  { %604 = vmatprep.subr.mxu0 %v253_v59 }
  0x48   :  { %605 = vmatpush3.msra.mxu0 %v253_v59 }
  0x49   :  { %606 = vmatprep.subr.mxu0 %v252_v60 }
  0x4a   :  { %607 = vmatpush3.msra.mxu0 %v252_v60 }
  0x4b   :  { %608 = vmatprep.subr.mxu0 %v251_v61 }
  0x4c   :  { %609 = vmatpush3.msra.mxu0 %v251_v61 }
  0x4d   :  { %610 = vmatprep.subr.mxu0 %v250_v62 }
  0x4e   :  { %611 = vmatpush3.msra.mxu0 %v250_v62 }
  0x4f   :  { %612 = vmatprep.subr.mxu0 %v249_v63 }
  0x50   :  { %613 = vmatpush3.msra.mxu0 %v249_v63 }
  0x51   :  { %614 = vmatprep.subr.mxu0 %v248_v0 }
  0x52   :  { %615 = vmatpush3.msra.mxu0 %v248_v0 }
  0x53   :  { %616 = vmatprep.subr.mxu0 %v247_v1 }
  0x54   :  { %617 = vmatpush3.msra.mxu0 %v247_v1 }
  0x55   :  { %618 = vmatprep.subr.mxu0 %v246_v2 }
  0x56   :  { %619 = vmatpush3.msra.mxu0 %v246_v2 }
  0x57   :  { %620 = vmatprep.subr.mxu0 %v245_v4 }
  0x58   :  { %621 = vmatpush3.msra.mxu0 %v245_v4 }
  0x59   :  { %622 = vmatprep.subr.mxu0 %v244_v7 }
  0x5a   :  { %623 = vmatpush3.msra.mxu0 %v244_v7 }
  0x5b   :  { %624 = vmatprep.subr.mxu0 %v243_v8 }
  0x5c   :  { %625 = vmatpush3.msra.mxu0 %v243_v8 }
  0xfc   :  { %v122_v25 = vpop.f32.mrf.mxu0 }
  0xfd   :  { %v123_v26 = vadd.f32 %v122_v25, %v55_v24 }
  0xfe   :  { %v558_v27 = vpop.f32.mrf.mxu0 }
  0xff   :  { %v452_v28 = vmul.f32 -1.442695, %v123_v26  ;;  %673 = vtanh.f32 %v123_v26 }
 0x101   :  { %675 = vpow2.f32 %v452_v28  ;;  %v341_v28 = vld [vmem:[#allocation5 + $0x1b8] sm:$0xff] }
 0x10c   :  { %v674_v36 = vpop.eup %673 }
 0x10d   :  { %133 = vrot.lane.b32.xlu0 %v674_v36, %s761_s0 }
 0x10e   :  { %v676_v38 = vpop.eup %675 }
 0x10f   :  { %v129_v40 = vadd.f32 1.0, %v676_v38 }
 0x111   :  { %677 = vrcp.f32 %v129_v40  ;;  %v355_v40 = vld [vmem:[#allocation5 + $0x228] sm:$0xff] }
 0x11e   :  { %v678_v42 = vpop.eup %677 }
 0x11f   :  { %136 = vrot.lane.b32.xlu0 %v678_v42, %s762_s1 }
 0x17f   :  { %v134_v43 = vpop.permute.xlu0 %133 }
 0x180   :  { %v135_v44 = vmul.f32 %v678_v42, %v134_v43  ;;  %v354_v42 = vld [vmem:[#allocation5 + $0x220] sm:$0xff] }
 0x182   :  { %679 = vtanh.f32 %v135_v44 }
 0x18f   :  { %v680_v45 = vpop.eup %679 }
 0x191   :  { %v137_v46 = vpop.permute.xlu0 %136 }
 0x192   :  { %v139_v47 = vmul.f32 %v680_v45, %v137_v46 }
 0x194   :  { %v241_v48 = vmax.f32 %v139_v47, 0.0  ;;  %592 = vmatmul.mubr.f32.vlgmr.msra.gmra.mxu1 %v139_v47 }
 0x195   :  { %630 = vmatpush3.msra.mxu1 %v353_v9 }
 0x196   :  { %626 = vmatprep.mubr.f32.mxu0 %v241_v48  ;;  %631 = vmatprep.subr.mxu1 %v352_v10 }
 0x197   :  { %632 = vmatpush3.msra.mxu1 %v352_v10 }
 0x198   :  { %633 = vmatprep.subr.mxu1 %v351_v11 }
 0x199   :  { %634 = vmatpush3.msra.mxu1 %v351_v11 }
 0x19a   :  { %635 = vmatprep.subr.mxu1 %v350_v12 }
 0x19b   :  { %636 = vmatpush3.msra.mxu1 %v350_v12 }
 0x19c   :  { %637 = vmatprep.subr.mxu1 %v349_v13 }
 0x19d   :  { %638 = vmatpush3.msra.mxu1 %v349_v13 }
 0x19e   :  { %639 = vmatprep.subr.mxu1 %v348_v15 }
 0x19f   :  { %640 = vmatpush3.msra.mxu1 %v348_v15 }
 0x1a0   :  { %641 = vmatprep.subr.mxu1 %v347_v16 }
 0x1a1   :  { %642 = vmatpush3.msra.mxu1 %v347_v16 }
 0x1a2   :  { %643 = vmatprep.subr.mxu1 %v346_v17 }
 0x1a3   :  { %644 = vmatpush3.msra.mxu1 %v346_v17 }
 0x1a4   :  { %645 = vmatprep.subr.mxu1 %v345_v18 }
 0x1a5   :  { %646 = vmatpush3.msra.mxu1 %v345_v18 }
 0x1a6   :  { %647 = vmatprep.subr.mxu1 %v344_v19 }
 0x1a7   :  { %648 = vmatpush3.msra.mxu1 %v344_v19 }
 0x1a8   :  { %649 = vmatprep.subr.mxu1 %v343_v20 }
 0x1a9   :  { %650 = vmatpush3.msra.mxu1 %v343_v20 }
 0x1aa   :  { %651 = vmatprep.subr.mxu1 %v342_v21 }
 0x1ab   :  { %652 = vmatpush3.msra.mxu1 %v342_v21 }
 0x1ac   :  { %653 = vmatprep.subr.mxu1 %v341_v28 }
 0x1ad   :  { %654 = vmatpush3.msra.mxu1 %v341_v28 }
 0x1ae   :  { %655 = vmatprep.subr.mxu1 %v340_v29 }
 0x1af   :  { %656 = vmatpush3.msra.mxu1 %v340_v29 }
 0x1b0   :  { %657 = vmatprep.subr.mxu1 %v339_v30 }
 0x1b1   :  { %658 = vmatpush3.msra.mxu1 %v339_v30 }
 0x1b2   :  { %659 = vmatprep.subr.mxu1 %v338_v31 }
 0x1b3   :  { %660 = vmatpush3.msra.mxu1 %v338_v31 }
 0x254   :  { %v223_v55 = vpop.f32.mrf.mxu1 }
 0x255   :  { %v224_v56 = vadd.f32 %v223_v55, %v156_v54 }
 0x256   :  { %v593_v57 = vpop.f32.mrf.mxu1 }
 0x257   :  { %v453_v58 = vmul.f32 -1.442695, %v224_v56  ;;  %681 = vtanh.f32 %v224_v56 }
 0x259   :  { %683 = vpow2.f32 %v453_v58 }
 0x264   :  { %v682_v3 = vpop.eup %681 }
 0x265   :  { %234 = vrot.lane.b32.xlu1 %v682_v3, %s761_s0 }
 0x266   :  { %v684_v5 = vpop.eup %683 }
 0x267   :  { %v230_v6 = vadd.f32 1.0, %v684_v5 }
 0x269   :  { %685 = vrcp.f32 %v230_v6 }
 0x276   :  { %v686_v14 = vpop.eup %685 }
 0x277   :  { %237 = vrot.lane.b32.xlu1 %v686_v14, %s762_s1 }
 0x2d7   :  { %v235_v22 = vpop.permute.xlu1 %234 }
 0x2d8   :  { %v236_v23 = vmul.f32 %v686_v14, %v235_v22 }
 0x2da   :  { %687 = vtanh.f32 %v236_v23 }
 0x2e7   :  { %v688_v24 = vpop.eup %687 }
 0x2e9   :  { %v238_v25 = vpop.permute.xlu1 %237 }
 0x2ea   :  { %v240_v26 = vmul.f32 %v688_v24, %v238_v25 }
 0x2ec   :  { %v242_v27 = vmax.f32 %v240_v26, 0.0 }
 0x2ee   :  { %627 = vmatmul.mubr.f32.vlgmr.msra.gmra.mxu0 %v242_v27 }
 0x3ae   :  { %v628_v33 = vpop.f32.mrf.mxu0 }
 0x3af   :  { %v333_v35 = vadd.f32 %v628_v33, %v260_v32 }
 0x3b0   :  { %v327_v36 = vpop.f32.mrf.mxu0 }
 0x3b1   :  { %v328_v37 = vadd.f32 %v327_v36, %v259_v34  ;;  %v337_v39 = vmax.f32 %v333_v35, 0.0 }
 0x3b3   :  { %v336_v38 = vmax.f32 %v328_v37, 0.0 }
 0x3b5   :  { %661 = vmatprep.mubr.f32.mxu1 %v336_v38 }
 0x3b6   :  { %662 = vmatmul.mubr.f32.vlgmr.msra.gmra.mxu1 %v337_v39 }
 0x476   :  { %v663_v41 = vpop.f32.mrf.mxu1 }
 0x477   :  { %v428_v43 = vadd.f32 %v663_v41, %v355_v40 }
 0x478   :  { %v422_v44 = vpop.f32.mrf.mxu1 }
 0x479   :  { %433 = vst [vmem:[#allocation7 + $0x8] sm:$0xff] %v428_v43  ;;  %v423_v45 = vadd.f32 %v422_v44, %v354_v42 }
 0x47b   :  { %431 = vst [vmem:[#allocation7] sm:$0xff] %v423_v45 }
 0x47c   :  { %740 = shalt.err (!%p737_p0)
}
 0x47d   :  { %445 = dma.vmem_to_hbm [thread:$0]  %s440_s22, 256, %s834_s2, [#allocation4], %s757_s17, %s757_s17, %s758_s18  }
 0x47e   :  { %753 = dma.done.wait [#allocation4], 256  }
 0x47f   :  { %754 = vsyncadd [#allocation4], 4294967040 }
 0x480   :  { %449 = vsyncpa [#allocation3], 1 }
 0x481   :  { %450 = vsyncpa [#allocation6], 1 }
 0x482   :  { %451 = vsyncpa [#allocation4], 1 }

</bundles_post_ra>
